<compile_context>
chip_gen: v5e
topology: v5e:2x2
jax: 0.10.0
libtpu: 0.0.40
codegen_flags: <defaults>
</compile_context>

<pallas_src>
import numpy as np
import jax
import jax.numpy as jnp
from jax.experimental import pallas as pl
from jax.experimental.pallas import tpu as pltpu


# ----------------------------- operator construction (host-side glue) -----------------

def _blur_matrix(n: int) -> np.ndarray:
    """y = B @ x applies the [1,2,1]/4 blur with replication padding along axis 0."""
    w = np.array([1.0, 2.0, 1.0], np.float32) / 4.0
    B = np.zeros((n, n), np.float32)
    rows = np.arange(n)
    for k in range(3):
        src = np.clip(rows + k - 1, 0, n - 1)
        np.add.at(B, (rows, src), w[k])
    return B


def _bicubic_half_matrix(n: int) -> np.ndarray:
    """out = D @ x : PyTorch bicubic (a=-0.75, align_corners=False) exact 2x downsample."""
    no = n // 2
    coeffs = np.array([-0.09375, 0.59375, 0.59375, -0.09375], np.float32)
    D = np.zeros((no, n), np.float32)
    rows = np.arange(no)
    for k in range(4):
        src = np.clip(2 * rows - 1 + k, 0, n - 1)
        np.add.at(D, (rows, src), coeffs[k])
    return D


def _make_operators(h: int, w: int):
    Bh = _blur_matrix(h)            # (H, H)
    Bw = _blur_matrix(w)            # (W, W)
    Dh = _bicubic_half_matrix(h)    # (Ho, H)
    Dw = _bicubic_half_matrix(w)    # (Wo, W)
    Lh = Dh @ Bh                    # (Ho, H)   left operator  (rows / H axis)
    Rw = (Dw @ Bw).T                # (W, Wo)   right operator (cols / W axis)
    return Lh.astype(np.float32), Rw.astype(np.float32)


# ----------------------------- Pallas kernel ------------------------------------------

def _downsample_kernel(x_ref, rw_ref, lht_ref, o_ref):
    # x_ref: (P, H, W) planes, rw_ref: (W, Wo), lht_ref: (H, Ho), o_ref: (P, Ho, Wo)
    P, H, W = x_ref.shape
    Ho = lht_ref.shape[1]
    Wo = rw_ref.shape[1]

    # W-axis contraction as one big matmul: (P*H, W) @ (W, Wo).
    x = x_ref[...].reshape(P * H, W)
    t = jnp.dot(x, rw_ref[...], preferred_element_type=jnp.float32)       # (P*H, Wo)

    # H-axis contraction as one big matmul: minor-dim transpose (XLU, cheap) then
    # (P*Wo, H) @ (H, Ho) instead of P tiny (Ho,H)@(H,Wo) matmuls.
    t = jnp.transpose(t.reshape(P, H, Wo), (0, 2, 1)).reshape(P * Wo, H)
    u = jnp.dot(t, lht_ref[...], preferred_element_type=jnp.float32)      # (P*Wo, Ho)

    out = jnp.transpose(u.reshape(P, Wo, Ho), (0, 2, 1))                  # (P, Ho, Wo)
    o_ref[...] = out.astype(o_ref.dtype)


def _choose_plane_batch(n_planes: int, h: int, w: int) -> int:
    """How many channel planes to fuse per grid step."""
    itemsize = 4
    plane_bytes = h * w * itemsize
    # Keep one raw input block <= 4 MiB so double-buffered in/out blocks plus in-kernel
    # intermediates stay well under the 32 MiB scoped VMEM default on every generation
    # (v7x has only 64 MiB physical VMEM per TensorCore).
    block_budget = 4 * 1024 * 1024
    p_max = max(1, block_budget // plane_bytes)
    # Enough rows to feed the MXU (M = P*H >= 256) and >= 64 KiB per grid step to
    # amortize the ~0.35 us per-step pipeline overhead.
    p_target = max(pl.cdiv(256, h), pl.cdiv(64 * 1024, plane_bytes))
    return int(max(1, min(n_planes, p_max, p_target)))


def downsample(x: jax.Array) -> jax.Array:
    """x: (B, C, H, W) float32  ->  (B, C, H//2, W//2) float32."""
    B, C, H, W = x.shape
    assert H % 2 == 0 and W % 2 == 0, "DownSample assumes even spatial dims"
    Ho, Wo = H // 2, W // 2
    N = B * C

    lh_np, rw_np = _make_operators(H, W)
    lht = jnp.asarray(lh_np.T)      # (H, Ho)
    rw = jnp.asarray(rw_np)         # (W, Wo)

    xf = x.reshape(N, H, W)

    P = _choose_plane_batch(N, H, W)
    num_blocks = pl.cdiv(N, P)
    Npad = num_blocks * P
    if Npad != N:
        xf = jnp.pad(xf, ((0, Npad - N), (0, 0), (0, 0)))

    # Advisory cost estimate (2 matmuls per plane) + explicit VMEM limit with headroom.
    flops = 2 * Npad * H * W * Wo + 2 * Npad * Wo * H * Ho
    bytes_accessed = 4 * (Npad * H * W + Npad * Ho * Wo + H * Ho + W * Wo)
    est_bytes = 4 * (2 * P * H * W + 2 * P * Ho * Wo + 2 * (H * Ho + W * Wo)
                     + 4 * P * H * Wo)
    vmem_limit = int(min(max(2 * est_bytes, 32 * 1024 * 1024), 64 * 1024 * 1024))

    out = pl.pallas_call(
        _downsample_kernel,
        out_shape=jax.ShapeDtypeStruct((Npad, Ho, Wo), x.dtype),
        grid=(num_blocks,),
        in_specs=[
            pl.BlockSpec((P, H, W), lambda n: (n, 0, 0)),   # P channel planes per step
            pl.BlockSpec((W, Wo), lambda n: (0, 0)),        # Rw   (grid-invariant)
            pl.BlockSpec((H, Ho), lambda n: (0, 0)),        # Lh^T (grid-invariant)
        ],
        out_specs=pl.BlockSpec((P, Ho, Wo), lambda n: (n, 0, 0)),
        compiler_params=pltpu.CompilerParams(
            dimension_semantics=("parallel",),
            vmem_limit_bytes=vmem_limit,
        ),
        cost_estimate=pl.CostEstimate(
            flops=flops, transcendentals=0, bytes_accessed=bytes_accessed),
    )(xf, rw, lht)

    return out[:N].reshape(B, C, Ho, Wo)


# ----------------------------- numpy reference (for verification only) ----------------

def _reference_downsample(x: np.ndarray) -> np.ndarray:
    B, C, H, W = x.shape
    kern = np.array([[1, 2, 1], [2, 4, 2], [1, 2, 1]], np.float32) / 16.0
    xp = np.pad(x, ((0, 0), (0, 0), (1, 1), (1, 1)), mode="edge")
    y = np.zeros_like(x)
    for i in range(3):
        for j in range(3):
            y += kern[i, j] * xp[:, :, i:i + H, j:j + W]
    Ho, Wo = H // 2, W // 2
    co = np.array([-0.09375, 0.59375, 0.59375, -0.09375], np.float32)
    out = np.zeros((B, C, Ho, Wo), np.float32)
    for r in range(Ho):
        for c in range(Wo):
            acc = np.zeros((B, C), np.float32)
            for i in range(4):
                hy = min(max(2 * r - 1 + i, 0), H - 1)
                for j in range(4):
                    wx = min(max(2 * c - 1 + j, 0), W - 1)
                    acc += co[i] * co[j] * y[:, :, hy, wx]
            out[:, :, r, c] = acc
    return out


# ----------------------------- main ----------------------------------------------------

if __name__ == "__main__":
    key = jax.random.PRNGKey(0)
    B, C, H, W = 2, 4, 16, 16
    x = jax.random.normal(key, (B, C, H, W), dtype=jnp.float32)

    out = downsample(x)
    out = jax.block_until_ready(out)

    assert out.shape == (B, C, H // 2, W // 2), out.shape

    ref = _reference_downsample(np.asarray(x))
    np.testing.assert_allclose(np.asarray(out), ref, rtol=1e-4, atol=1e-5)

    print("KERNEL_OK")
</pallas_src>

<mosaic_0001>
module attributes {stable_mosaic.version = 11 : i64} {
  func.func @_downsample_kernel(%arg0: i32, %arg1: memref<8x16x16xf32, #tpu.memory_space<vmem>>, %arg2: memref<16x8xf32, #tpu.memory_space<vmem>>, %arg3: memref<16x8xf32, #tpu.memory_space<vmem>>, %arg4: memref<8x8x8xf32, #tpu.memory_space<vmem>>) attributes {dimension_semantics = [#tpu.dimension_semantics<parallel>], iteration_bounds = array<i64: 1>, scalar_prefetch = 0 : i64, scratch_operands = 0 : i64, tpu.core_type = #tpu.core_type<tc>, window_params = [{transform_indices = @transform_0, window_bounds = array<i64: 8, 16, 16>}, {pipeline_mode = #tpu.pipeline_mode<synchronous>, transform_indices = @transform_1, window_bounds = array<i64: 16, 8>}, {pipeline_mode = #tpu.pipeline_mode<synchronous>, transform_indices = @transform_2, window_bounds = array<i64: 16, 8>}, {transform_indices = @transform_3, window_bounds = array<i64: 8, 8, 8>}]} {
    %c0 = arith.constant 0 : index
    %c0_0 = arith.constant 0 : index
    %c0_1 = arith.constant 0 : index
    %0 = vector.load %arg1[%c0, %c0_0, %c0_1] : memref<8x16x16xf32, #tpu.memory_space<vmem>>, vector<8x16x16xf32>
    %1 = vector.shape_cast %0 : vector<8x16x16xf32> to vector<128x16xf32>
    %c0_2 = arith.constant 0 : index
    %c0_3 = arith.constant 0 : index
    %2 = vector.load %arg2[%c0_2, %c0_3] : memref<16x8xf32, #tpu.memory_space<vmem>>, vector<16x8xf32>
    %cst = arith.constant dense<0.000000e+00> : vector<128x8xf32>
    %3 = tpu.matmul %1, %2, %cst {dimension_numbers = #tpu.dot_dimension_numbers<[1], [0], [0], [1], [0, 0, 1, 1], [], []>} : vector<128x16xf32>, vector<16x8xf32>, vector<128x8xf32> -> vector<128x8xf32>
    %4 = vector.shape_cast %3 : vector<128x8xf32> to vector<8x16x8xf32>
    %5 = tpu.transpose %4, [0, 2, 1] : vector<8x16x8xf32> -> vector<8x8x16xf32>
    %6 = vector.shape_cast %5 : vector<8x8x16xf32> to vector<64x16xf32>
    %c0_4 = arith.constant 0 : index
    %c0_5 = arith.constant 0 : index
    %7 = vector.load %arg3[%c0_4, %c0_5] : memref<16x8xf32, #tpu.memory_space<vmem>>, vector<16x8xf32>
    %cst_6 = arith.constant dense<0.000000e+00> : vector<64x8xf32>
    %8 = tpu.matmul %6, %7, %cst_6 {dimension_numbers = #tpu.dot_dimension_numbers<[1], [0], [0], [1], [0, 0, 1, 1], [], []>} : vector<64x16xf32>, vector<16x8xf32>, vector<64x8xf32> -> vector<64x8xf32>
    %9 = vector.shape_cast %8 : vector<64x8xf32> to vector<8x8x8xf32>
    %10 = tpu.transpose %9, [0, 2, 1] : vector<8x8x8xf32> -> vector<8x8x8xf32>
    %c0_7 = arith.constant 0 : index
    %c0_8 = arith.constant 0 : index
    %c0_9 = arith.constant 0 : index
    %11 = vector.load %arg4[%c0_7, %c0_8, %c0_9] : memref<8x8x8xf32, #tpu.memory_space<vmem>>, vector<8x8x8xf32>
    tpu.vector_store %arg4[%c0_7, %c0_8, %c0_9], %10 {strides = array<i32>} : memref<8x8x8xf32, #tpu.memory_space<vmem>>, vector<8x8x8xf32>,
    return
  }
  func.func @transform_0(%arg0: i32) -> (i32, i32, i32) {
    %c0_i32 = arith.constant 0 : i32
    %c0_i32_0 = arith.constant 0 : i32
    %c0_i32_1 = arith.constant 0 : i32
    return %arg0, %c0_i32, %c0_i32_0 : i32, i32, i32
  }
  func.func @transform_1(%arg0: i32) -> (i32, i32) {
    %c0_i32 = arith.constant 0 : i32
    %c0_i32_0 = arith.constant 0 : i32
    %c0_i32_1 = arith.constant 0 : i32
    return %c0_i32, %c0_i32_0 : i32, i32
  }
  func.func @transform_2(%arg0: i32) -> (i32, i32) {
    %c0_i32 = arith.constant 0 : i32
    %c0_i32_0 = arith.constant 0 : i32
    %c0_i32_1 = arith.constant 0 : i32
    return %c0_i32, %c0_i32_0 : i32, i32
  }
  func.func @transform_3(%arg0: i32) -> (i32, i32, i32) {
    %c0_i32 = arith.constant 0 : i32
    %c0_i32_0 = arith.constant 0 : i32
    %c0_i32_1 = arith.constant 0 : i32
    return %arg0, %c0_i32, %c0_i32_0 : i32, i32, i32
  }
}

</mosaic_0001>

<bundles_post_ra>
// kernel: tpu_custom_call.1
= control target key start
LH: loop header
LB: loop body
LE: loop exit
PB: predicated region body
PF: predicated region fallthrough
CT: control target
= control target key end

     0   :  { %8 = vsyncpa [#allocation3], 0  ;;  %s937_s0 = inlined_call_operand.hbm [shape: f32[8,16,16], index: 0, kind: input, shape index: {}]   ;;  %s938_s1 = inlined_call_operand.vmem [shape: f32[16,8], index: 1, kind: input, shape index: {}]   ;;  %s939_s2 = inlined_call_operand.vmem [shape: f32[16,8], index: 2, kind: input, shape index: {}]   ;;  %s940_s3 = inlined_call_operand.hbm [shape: f32[8,8,8], index: 3, kind: output, shape index: {}]  }
   0x1   :  { %9 = vsyncpa [#allocation4], 0  ;;  %s14_s14 = sshll.u32 %s937_s0, 4  ;;  %s857_s15 = smov [#allocation2]   ;;  %s15_s14 = int_to_ptr.hbm [resolvable:$true] %s14_s14 }
   0x2   :  { %s16_s16 = sshll.u32 %s857_s15, 4  ;;  %s858_s17 = smov 128   ;;  %s17_s16 = int_to_ptr.vmem [resolvable:$true] %s16_s16 }
   0x3   :  { %s859_s18 = smov 8  }
   0x4   :  { %22 = dma.hbm_to_vmem [thread:$0]  %s15_s14, 2048, %s17_s16, [#allocation3], %s858_s17, %s858_s17, %s859_s18  }
   0x5   :  { %853 = dma.done.wait [#allocation3], 2048  }
   0x6   :  { %854 = vsyncadd [#allocation3], 4294965248  ;;  %v48_v0 = vld [vmem:[%s938_s1 + $0x8] sm:$0xff]  ;;  %v47_v1 = vld [vmem:[%s938_s1] sm:$0xff]  ;;  %vm49_vm0 = vcmask 130048   ;;  %vm742_vm1 = vcmask 64512  }
   0x7   :  { %112 = vmatpush.msra.mxu0 %v48_v0  ;;  %v31_v2 = vld [vmem:[#allocation2] sm:$0xff]  ;;  %794 = vmatpush.msra.mxu2 %v48_v0  ;;  %v37_v3 = vld [vmem:[#allocation2 + $0x30] sm:$0xff]  ;;  %v32_v5 = vld [vmem:[#allocation2 + $0x8] sm:$0xff]  ;;  %s757_s28 = sshll.u32 %s940_s3, 4  ;;  %s758_s28 = int_to_ptr.hbm [resolvable:$true] %s757_s28 }
   0x8   :  { %795 = vmatpush.msra.mxu3 %v48_v0  ;;  %v43_v4 = vld [vmem:[#allocation2 + $0x60] sm:$0xff]  ;;  %v38_v6 = vld [vmem:[#allocation2 + $0x38] sm:$0xff]  ;;  %v44_v7 = vld [vmem:[#allocation2 + $0x68] sm:$0xff] }
   0x9   :  { %113 = vmatpush.msra.mxu0 %v47_v1  ;;  %796 = vmatpush.msra.mxu2 %v47_v1  ;;  %v33_v8 = vld [vmem:[#allocation2 + $0x10] sm:$0xff]  ;;  %v39_v9 = vld [vmem:[#allocation2 + $0x40] sm:$0xff]  ;;  %v34_v11 = vld [vmem:[#allocation2 + $0x18] sm:$0xff] }
   0xa   :  { %770 = vmatmul.msk.f32.vlgmr.msra.gmra.mxu0 %vm49_vm0, %v31_v2  ;;  %776 = vmatmul.msk.f32.vlgmr.msra.gmra.mxu2 %vm49_vm0, %v37_v3  ;;  %v45_v10 = vld [vmem:[#allocation2 + $0x70] sm:$0xff]  ;;  %v40_v12 = vld [vmem:[#allocation2 + $0x48] sm:$0xff]  ;;  %v46_v13 = vld [vmem:[#allocation2 + $0x78] sm:$0xff] }
   0xb   :  { %797 = vmatpush.msra.mxu3 %v47_v1  ;;  %v35_v14 = vld [vmem:[#allocation2 + $0x20] sm:$0xff]  ;;  %v41_v15 = vld [vmem:[#allocation2 + $0x50] sm:$0xff]  ;;  %v36_v16 = vld [vmem:[#allocation2 + $0x28] sm:$0xff] }
   0xc   :  { %782 = vmatmul.msk.f32.vlgmr.msra.gmra.mxu3 %vm49_vm0, %v43_v4  ;;  %v42_v17 = vld [vmem:[#allocation2 + $0x58] sm:$0xff]  ;;  %v420_v27 = vld [vmem:[%s939_s2 + $0x8] sm:$0xff]  ;;  %v419_v28 = vld [vmem:[%s939_s2] sm:$0xff]  ;;  %s860_s2 = smov [#allocation5]  }
   0xd   :  { %459 = vmatpush.msra.mxu1 %v420_v27  ;;  %798 = vmatpush.msrb.mxu3 %v420_v27  ;;  %s755_s25 = sshll.u32 %s860_s2, 4  ;;  %s756_s25 = int_to_ptr.vmem [resolvable:$true] %s755_s25 }
   0xf   :  { %460 = vmatpush.msra.mxu1 %v419_v28  ;;  %799 = vmatpush.msrb.mxu3 %v419_v28 }
  0x12   :  { %771 = vmatmul.msk.f32.gmra.mxu0 %vm49_vm0, %v32_v5  ;;  %777 = vmatmul.msk.f32.gmra.mxu2 %vm49_vm0, %v38_v6 }
  0x14   :  { %783 = vmatmul.msk.f32.gmra.mxu3 %vm49_vm0, %v44_v7 }
  0x1a   :  { %772 = vmatmul.msk.f32.gmra.mxu0 %vm49_vm0, %v33_v8  ;;  %778 = vmatmul.msk.f32.gmra.mxu2 %vm49_vm0, %v39_v9 }
  0x1c   :  { %784 = vmatmul.msk.f32.gmra.mxu3 %vm49_vm0, %v45_v10 }
  0x22   :  { %773 = vmatmul.msk.f32.gmra.mxu0 %vm49_vm0, %v34_v11  ;;  %779 = vmatmul.msk.f32.gmra.mxu2 %vm49_vm0, %v40_v12 }
  0x24   :  { %785 = vmatmul.msk.f32.gmra.mxu3 %vm49_vm0, %v46_v13 }
  0x2a   :  { %774 = vmatmul.msk.f32.gmra.mxu0 %vm49_vm0, %v35_v14  ;;  %780 = vmatmul.msk.f32.gmra.mxu2 %vm49_vm0, %v41_v15 }
  0x32   :  { %775 = vmatmul.msk.f32.gmra.mxu0 %vm49_vm0, %v36_v16  ;;  %781 = vmatmul.msk.f32.gmra.mxu2 %vm49_vm0, %v42_v17 }
  0x87   :  { %v115_v18 = vpop.f32.mrf.mxu0 }
  0x88   :  { %163 = vxpose.xlu0.b32.start [1/2] (short) (narrow) %v115_v18, 8 }
  0x8d   :  { %v133_v19 = vpop.f32.mrf.mxu2 }
  0x8f   :  { %v118_v20 = vpop.f32.mrf.mxu0  ;;  %v151_v21 = vpop.f32.mrf.mxu3 }
  0x90   :  { %164 = vxpose.xlu0.b32.end [2/2] (short) (narrow) %v118_v20, 8 }
  0x95   :  { %v136_v22 = vpop.f32.mrf.mxu2 }
  0x97   :  { %v121_v23 = vpop.f32.mrf.mxu0  ;;  %v154_v24 = vpop.f32.mrf.mxu3 }
  0x98   :  { %259 = vxpose.xlu0.b32.start [1/2] (short) (narrow) %v133_v19, 8  ;;  %195 = vxpose.xlu1.b32.start [1/2] (short) (narrow) %v121_v23, 8 }
  0x9d   :  { %v139_v26 = vpop.f32.mrf.mxu2 }
  0x9f   :  { %v124_v25 = vpop.f32.mrf.mxu0  ;;  %v157_v29 = vpop.f32.mrf.mxu3 }
  0xa0   :  { %260 = vxpose.xlu0.b32.end [2/2] (short) (narrow) %v136_v22, 8  ;;  %196 = vxpose.xlu1.b32.end [2/2] (short) (narrow) %v124_v25, 8 }
  0xa5   :  { %v142_v31 = vpop.f32.mrf.mxu2 }
  0xa7   :  { %v127_v30 = vpop.f32.mrf.mxu0  ;;  %v160_v32 = vpop.f32.mrf.mxu3 }
  0xa8   :  { %355 = vxpose.xlu1.b32.start [1/2] (short) (narrow) %v151_v21, 8  ;;  %227 = vxpose.xlu2.b32.start [1/2] (short) (narrow) %v127_v30, 8 }
  0xa9   :  { %387 = vxpose.xlu0.b32.start [1/2] (short) (narrow) %v157_v29, 8 }
  0xad   :  { %v145_v34 = vpop.f32.mrf.mxu2 }
  0xaf   :  { %v130_v33 = vpop.f32.mrf.mxu0 }
  0xb0   :  { %356 = vxpose.xlu1.b32.end [2/2] (short) (narrow) %v154_v24, 8  ;;  %228 = vxpose.xlu2.b32.end [2/2] (short) (narrow) %v130_v33, 8 }
  0xb1   :  { %388 = vxpose.xlu0.b32.end [2/2] (short) (narrow) %v160_v32, 8 }
  0xb5   :  { %v148_v35 = vpop.f32.mrf.mxu2 }
  0xb8   :  { %323 = vxpose.xlu1.b32.start [1/2] (short) (narrow) %v145_v34, 8  ;;  %291 = vxpose.xlu2.b32.start [1/2] (short) (narrow) %v139_v26, 8 }
  0xc0   :  { %324 = vxpose.xlu1.b32.end [2/2] (short) (narrow) %v148_v35, 8  ;;  %292 = vxpose.xlu2.b32.end [2/2] (short) (narrow) %v142_v31, 8 }
 0x12c   :  { %v179_v36 = vpop.trf.xlu0 }
 0x12d   :  { %786 = vmatmul.msk.f32.vlgmr.msra.gmra.mxu1 %vm49_vm0, %v179_v36 }
 0x13c   :  { %v211_v37 = vpop.trf.xlu1  ;;  %v275_v39 = vpop.trf.xlu0 }
 0x13d   :  { %787 = vmatmul.msk.f32.gmra.mxu1 %vm49_vm0, %v211_v37 }
 0x141   :  { %v243_v38 = vpop.trf.xlu2 }
 0x145   :  { %788 = vmatmul.msk.f32.gmra.mxu1 %vm49_vm0, %v243_v38 }
 0x14c   :  { %v371_v40 = vpop.trf.xlu1 }
 0x14d   :  { %789 = vmatmul.msk.f32.gmra.mxu1 %vm49_vm0, %v275_v39  ;;  %792 = vmatmul.msk.f32.vlgmr.msrb.gmra.mxu3 %vm49_vm0, %v371_v40  ;;  %v403_v42 = vpop.trf.xlu0 }
 0x151   :  { %v307_v41 = vpop.trf.xlu2 }
 0x155   :  { %790 = vmatmul.msk.f32.gmra.mxu1 %vm49_vm0, %v307_v41  ;;  %793 = vmatmul.msk.f32.gmra.mxu3 %vm49_vm0, %v403_v42 }
 0x15c   :  { %v339_v43 = vpop.trf.xlu1 }
 0x15d   :  { %791 = vmatmul.msk.f32.gmra.mxu1 %vm49_vm0, %v339_v43 }
 0x1aa   :  { %v462_v44 = vpop.f32.mrf.mxu1 }
 0x1ab   :  { %486 = vxpose.xlu2.b32.start.end [1/1] (short) (narrow) %v462_v44, 8 }
 0x1ba   :  { %v465_v45 = vpop.f32.mrf.mxu1 }
 0x1bb   :  { %518 = vxpose.xlu2.b32.start.end [1/1] (short) (narrow) %v465_v45, 8 }
 0x1c2   :  { %v468_v46 = vpop.f32.mrf.mxu1 }
 0x1c3   :  { %550 = vxpose.xlu0.b32.start.end [1/1] (short) (narrow) %v468_v46, 8 }
 0x1ca   :  { %v471_v47 = vpop.f32.mrf.mxu1 }
 0x1cb   :  { %582 = vxpose.xlu1.b32.start.end [1/1] (short) (narrow) %v471_v47, 8 }
 0x1d0   :  { %v480_v48 = vpop.f32.mrf.mxu3 }
 0x1d2   :  { %v474_v49 = vpop.f32.mrf.mxu1 }
 0x1d3   :  { %614 = vxpose.xlu2.b32.start.end [1/1] (short) (narrow) %v474_v49, 8  ;;  %678 = vxpose.xlu1.b32.start.end [1/1] (short) (narrow) %v480_v48, 8 }
 0x1d8   :  { %v483_v50 = vpop.f32.mrf.mxu3 }
 0x1da   :  { %v477_v51 = vpop.f32.mrf.mxu1 }
 0x1db   :  { %646 = vxpose.xlu0.b32.start.end [1/1] (short) (narrow) %v477_v51, 8  ;;  %710 = vxpose.xlu2.b32.start.end [1/1] (short) (narrow) %v483_v50, 8 }
 0x244   :  { %v502_v52 = vpop.trf.xlu2 }
 0x245   :  { %743 = vst.msk [vmem:[#allocation5] sm:$0xff] %vm742_vm1, %v502_v52 }
 0x254   :  { %v534_v53 = vpop.trf.xlu2 }
 0x255   :  { %744 = vst.msk [vmem:[#allocation5 + $0x8] sm:$0xff] %vm742_vm1, %v534_v53 }
 0x267   :  { %v566_v54 = vpop.trf.xlu0 }
 0x268   :  { %745 = vst.msk [vmem:[#allocation5 + $0x10] sm:$0xff] %vm742_vm1, %v566_v54 }
 0x26c   :  { %v630_v55 = vpop.trf.xlu2 }
 0x26d   :  { %747 = vst.msk [vmem:[#allocation5 + $0x20] sm:$0xff] %vm742_vm1, %v630_v55 }
 0x26f   :  { %v598_v56 = vpop.trf.xlu1 }
 0x270   :  { %746 = vst.msk [vmem:[#allocation5 + $0x18] sm:$0xff] %vm742_vm1, %v598_v56 }
 0x274   :  { %v726_v57 = vpop.trf.xlu2 }
 0x275   :  { %750 = vst.msk [vmem:[#allocation5 + $0x38] sm:$0xff] %vm742_vm1, %v726_v57 }
 0x277   :  { %v694_v58 = vpop.trf.xlu1 }
 0x278   :  { %749 = vst.msk [vmem:[#allocation5 + $0x30] sm:$0xff] %vm742_vm1, %v694_v58 }
 0x27f   :  { %v662_v59 = vpop.trf.xlu0 }
 0x280   :  { %748 = vst.msk [vmem:[#allocation5 + $0x28] sm:$0xff] %vm742_vm1, %v662_v59 }
 0x281   :  { %763 = dma.vmem_to_hbm [thread:$0]  %s756_s25, 1024, %s758_s28, [#allocation4], %s858_s17, %s858_s17, %s859_s18  }
 0x282   :  { %855 = dma.done.wait [#allocation4], 1024  }
 0x283   :  { %856 = vsyncadd [#allocation4], 4294966272 }
 0x284   :  { %768 = vsyncpa [#allocation3], 1 }
 0x285   :  { %769 = vsyncpa [#allocation4], 1 }

</bundles_post_ra>
